<compile_context>
chip_gen: v7x
topology: tpu7x:2x2x1
jax: 0.10.0
libtpu: 0.0.40
codegen_flags: <defaults>
</compile_context>

<pallas_src>
import math

import jax
import jax.numpy as jnp
from jax.experimental import pallas as pl
from jax.experimental.pallas import tpu as pltpu


def _round_up(n, m):
    return ((n + m - 1) // m) * m


def _cdiv(a, b):
    return (a + b - 1) // b


def _device_kind():
    try:
        return jax.devices()[0].device_kind.lower()
    except Exception:
        return ""


def _vmem_budget_bytes():
    """Per-core VMEM budget with ~25% headroom for compiler scratch."""
    cap = None
    try:
        info = pltpu.get_tpu_info()
        cap = getattr(info, "vmem_capacity_bytes", None)
    except Exception:
        cap = None
    if not cap:
        kind = _device_kind()
        cap = (64 << 20) if "v7" in kind else (128 << 20)
    return int(cap) * 3 // 4   # ~48 MiB on v7x, ~96 MiB on v5e/v6e


# ---------------------------------------------------------------------------
# Kernels
# ---------------------------------------------------------------------------

def _csls_kernel(x_ref, wm_ref, gate_ref, bias_ref, o_ref):
    """out = (x @ wm) * gate + eff_bias   (full-K block, f32 MXU accumulation)."""
    acc = jnp.dot(x_ref[...], wm_ref[...], preferred_element_type=jnp.float32)
    o_ref[...] = (acc * gate_ref[...] + bias_ref[...]).astype(o_ref.dtype)


def _csls_kernel_ktiled(x_ref, wm_ref, gate_ref, bias_ref, o_ref, acc_ref):
    """K-tiled variant: f32 VMEM accumulator, init at k==0, epilogue at k==last."""
    k = pl.program_id(2)

    @pl.when(k == 0)
    def _():
        acc_ref[...] = jnp.zeros_like(acc_ref)

    acc_ref[...] += jnp.dot(x_ref[...], wm_ref[...],
                            preferred_element_type=jnp.float32)

    @pl.when(k == pl.num_programs(2) - 1)
    def _():
        o_ref[...] = (acc_ref[...] * gate_ref[...]
                      + bias_ref[...]).astype(o_ref.dtype)


# ---------------------------------------------------------------------------
# Wrapper
# ---------------------------------------------------------------------------

def prepare_masked_weight(weight, weight_mask, compute_dtype=jnp.float32):
    """Precompute the t-independent masked/transposed weight (dim_in, dim_out).

    Call once per set of parameters and pass the result to
    `concat_squash_linear_sparse(..., masked_weight_t=...)` so repeated calls
    (e.g. inside a CNF/ODE solver loop) skip the full-weight mask-mul,
    transpose and dtype cast.
    """
    wf = weight_mask.astype(jnp.float32) * weight.astype(jnp.float32)
    return wf.T.astype(compute_dtype)           # (dim_in, dim_out)


def concat_squash_linear_sparse(t, x, weight, weight_mask, bias,
                                hyper_gate_w, hyper_gate_b, hyper_bias_w,
                                *, masked_weight_t=None,
                                tm=256, tn=256,
                                compute_dtype=jnp.float32):
    """Pallas forward of ConcatSquashLinearSparse.

    t:             scalar (python float or 0-d / (1,1) array)
    x:             (B, dim_in)
    weight:        (dim_out, dim_in) or None if masked_weight_t is given
    weight_mask:   (dim_out, dim_in) or None if masked_weight_t is given
    bias:          (dim_out,)
    hyper_gate_w:  (dim_out, 1)
    hyper_gate_b:  (dim_out,)
    hyper_bias_w:  (dim_out, 1)
    masked_weight_t: optional cached (dim_in, dim_out) = (weight_mask*weight).T
    compute_dtype: matmul operand dtype.  float32 (default) matches PyTorch
                   semantics; jnp.bfloat16 is a faster, documented opt-in
                   (f32 accumulation on the MXU either way).
    """
    B, K = x.shape
    N = bias.shape[0]
    out_dtype = x.dtype
    t_scalar = jnp.asarray(t, jnp.float32).reshape(())

    # ---- t-dependent, O(dim_out) work only (cheap per ODE step) ----
    gate = jax.nn.sigmoid(
        t_scalar * hyper_gate_w.reshape(-1).astype(jnp.float32)
        + hyper_gate_b.astype(jnp.float32))                                 # (N,)
    eff_bias = (bias.astype(jnp.float32) * gate
                + t_scalar * hyper_bias_w.reshape(-1).astype(jnp.float32))  # (N,)
    gate2d = gate.reshape(1, N)
    bias2d = eff_bias.reshape(1, N)

    # ---- t-independent weight prep (hoist via prepare_masked_weight) ----
    if masked_weight_t is None:
        masked_weight_t = prepare_masked_weight(weight, weight_mask, compute_dtype)
    wm = masked_weight_t.astype(compute_dtype)                              # (K, N)

    # ---- tile / path selection ----
    cd = jnp.dtype(compute_dtype).itemsize
    od = jnp.dtype(out_dtype).itemsize
    sub = {4: 8, 2: 16, 1: 32}.get(cd, 8)      # sublane packing multiple
    kind = _device_kind()
    is_v7 = "v7" in kind
    budget = _vmem_budget_bytes()
    slack = 2 << 20

    tm = _round_up(min(int(tm), max(B, 1)), sub)
    # v7x has 2 TensorCores: make sure there are >= 2 batch tiles when possible.
    if is_v7 and _cdiv(B, tm) < 2 and B > sub:
        tm = _round_up(_cdiv(B, 2), sub)
    Bp = _round_up(B, tm)

    def fits(est):
        return est + slack <= budget

    case = None
    tn_sel = None
    tk_sel = None
    est_sel = None

    # Case A: whole weight resident in VMEM, N untiled, 1-D grid over batch.
    est_a = (2 * tm * K * cd) + (2 * K * N * cd) + (2 * tm * N * od) + (4 * N * 4)
    if fits(est_a):
        case = "A"
        est_sel = est_a
    else:
        # Case B: K untiled, N tiled; N outermost so the weight column block is
        # fetched once and reused across all inner batch tiles.
        cands = []
        for c in (int(tn), 512, 256, 128):
            c = min(max(128, _round_up(c, 128)), _round_up(N, 128))
            if c not in cands:
                cands.append(c)
        cands.sort(reverse=True)
        for c in cands:
            est_b = ((2 * tm * K * cd) + (2 * K * c * cd)
                     + (2 * tm * c * od) + (4 * c * 4))
            if fits(est_b):
                case, tn_sel, est_sel = "B", c, est_b
                break
        else:
            # Case C: tile K as well, accumulate in an f32 VMEM scratch.
            case = "C"
            tn_sel = min(256, _round_up(N, 128))
            for tk_c in (4096, 2048, 1024, 512, 256, 128):
                est_c = ((2 * tm * tk_c * cd) + (2 * tk_c * tn_sel * cd)
                         + (2 * tm * tn_sel * od) + (4 * tn_sel * 4)
                         + tm * tn_sel * 4)
                if fits(est_c):
                    tk_sel, est_sel = tk_c, est_c
                    break
            if tk_sel is None:
                tk_sel, tn_sel = 128, 128
                est_sel = ((2 * tm * tk_sel * cd) + (2 * tk_sel * tn_sel * cd)
                           + (2 * tm * tn_sel * od) + (4 * tn_sel * 4)
                           + tm * tn_sel * 4)

    # ---- build operands / specs per case ----
    x_in = x.astype(compute_dtype)
    scratch = None

    if case == "A":
        Np = N
        if Bp != B:
            x_in = jnp.pad(x_in, ((0, Bp - B), (0, 0)))
        operands = (x_in, wm, gate2d, bias2d)
        grid = (Bp // tm,)
        in_specs = [
            pl.BlockSpec((tm, K), lambda i: (i, 0)),   # x: batch-tiled, full K
            pl.BlockSpec((K, N), lambda i: (0, 0)),    # weight: fully resident
            pl.BlockSpec((1, N), lambda i: (0, 0)),    # gate
            pl.BlockSpec((1, N), lambda i: (0, 0)),    # folded bias
        ]
        out_specs = pl.BlockSpec((tm, N), lambda i: (i, 0))
        kernel = _csls_kernel
        semantics = ("parallel",)

    elif case == "B":
        tn_b = tn_sel
        Np = _round_up(N, tn_b)
        if Bp != B:
            x_in = jnp.pad(x_in, ((0, Bp - B), (0, 0)))
        wm_in = wm if Np == N else jnp.pad(wm, ((0, 0), (0, Np - N)))
        gate_in = gate2d if Np == N else jnp.pad(gate2d, ((0, 0), (0, Np - N)))
        bias_in = bias2d if Np == N else jnp.pad(bias2d, ((0, 0), (0, Np - N)))
        operands = (x_in, wm_in, gate_in, bias_in)
        grid = (Np // tn_b, Bp // tm)                  # N outermost (weight reuse)
        in_specs = [
            pl.BlockSpec((tm, K), lambda j, i: (i, 0)),
            pl.BlockSpec((K, tn_b), lambda j, i: (0, j)),   # invariant over inner i
            pl.BlockSpec((1, tn_b), lambda j, i: (0, j)),
            pl.BlockSpec((1, tn_b), lambda j, i: (0, j)),
        ]
        out_specs = pl.BlockSpec((tm, tn_b), lambda j, i: (i, j))
        kernel = _csls_kernel
        semantics = ("parallel", "parallel")

    else:  # case == "C"
        tn_c, tk_c = tn_sel, tk_sel
        Np = _round_up(N, tn_c)
        Kp = _round_up(K, tk_c)
        x_in = jnp.pad(x_in, ((0, Bp - B), (0, Kp - K)))
        wm_in = jnp.pad(wm, ((0, Kp - K), (0, Np - N)))
        gate_in = jnp.pad(gate2d, ((0, 0), (0, Np - N)))
        bias_in = jnp.pad(bias2d, ((0, 0), (0, Np - N)))
        operands = (x_in, wm_in, gate_in, bias_in)
        grid = (Np // tn_c, Bp // tm, Kp // tk_c)      # K innermost (reduction)
        # On v5e/v6e (streamed weight, lower HBM BW) use a third buffer on the
        # weight stream if there is VMEM headroom for it.
        triple = (not is_v7) and fits(est_sel + tk_c * tn_c * cd)
        if triple:
            wm_spec = pl.BlockSpec((tk_c, tn_c), lambda j, i, k: (k, j),
                                   pipeline_mode=pl.Buffered(3))
        else:
            wm_spec = pl.BlockSpec((tk_c, tn_c), lambda j, i, k: (k, j))
        in_specs = [
            pl.BlockSpec((tm, tk_c), lambda j, i, k: (i, k)),
            wm_spec,
            pl.BlockSpec((1, tn_c), lambda j, i, k: (0, j)),
            pl.BlockSpec((1, tn_c), lambda j, i, k: (0, j)),
        ]
        out_specs = pl.BlockSpec((tm, tn_c), lambda j, i, k: (i, j))
        kernel = _csls_kernel_ktiled
        scratch = [pltpu.VMEM((tm, tn_c), jnp.float32)]
        semantics = ("parallel", "parallel", "arbitrary")

    vmem_limit = int(min(budget, max(est_sel + (4 << 20), 32 << 20)))
    cost = pl.CostEstimate(
        flops=2 * B * K * N,
        transcendentals=0,
        bytes_accessed=int(B * K * cd + K * N * cd + 2 * N * 4 + B * N * od),
    )

    call_kwargs = dict(
        out_shape=jax.ShapeDtypeStruct((Bp, Np), out_dtype),
        grid=grid,
        in_specs=in_specs,
        out_specs=out_specs,
        compiler_params=pltpu.CompilerParams(
            dimension_semantics=semantics,
            vmem_limit_bytes=vmem_limit),
        cost_estimate=cost,
    )
    if scratch is not None:
        call_kwargs["scratch_shapes"] = scratch

    out = pl.pallas_call(kernel, **call_kwargs)(*operands)
    if Bp != B or Np != N:
        out = out[:B, :N]
    return out


# ---------------------------------------------------------------------------
# Pure-JAX reference (mirrors the PyTorch forward exactly, f32)
# ---------------------------------------------------------------------------

def reference_forward(t, x, weight, weight_mask, bias,
                      hyper_gate_w, hyper_gate_b, hyper_bias_w):
    w = weight_mask * weight                                 # (dim_out, dim_in)
    res = bias[None, :] + x @ w.T                            # (B, dim_out)
    t11 = jnp.asarray(t, jnp.float32).reshape(1, 1)
    gate = jax.nn.sigmoid(t11 @ hyper_gate_w.T + hyper_gate_b[None, :])
    hb = t11 @ hyper_bias_w.T
    return res * gate + hb


if __name__ == "__main__":
    def make_params(key, B, dim_in, dim_out):
        k_x, k_w, k_b, k_gw, k_gb, k_hb = jax.random.split(key, 6)
        adjacency = [[a, b] for a in range(dim_out) for b in range(dim_in)
                     if (a + 2 * b) % 3 == 0]
        mask = jnp.zeros((dim_out, dim_in), jnp.float32)
        rows = jnp.array([a for a, b in adjacency], jnp.int32)
        cols = jnp.array([b for a, b in adjacency], jnp.int32)
        mask = mask.at[rows, cols].set(1.0)
        kb = 1.0 / math.sqrt(dim_in)
        weight = jax.random.uniform(k_w, (dim_out, dim_in), jnp.float32, -kb, kb)
        bias = jax.random.uniform(k_b, (dim_out,), jnp.float32, -kb, kb)
        hyper_gate_w = jax.random.uniform(k_gw, (dim_out, 1), jnp.float32, -1.0, 1.0)
        hyper_gate_b = jax.random.uniform(k_gb, (dim_out,), jnp.float32, -1.0, 1.0)
        hyper_bias_w = jax.random.uniform(k_hb, (dim_out, 1), jnp.float32, -1.0, 1.0)
        x = jax.random.normal(k_x, (B, dim_in), jnp.float32)
        return x, weight, mask, bias, hyper_gate_w, hyper_gate_b, hyper_bias_w

    key = jax.random.PRNGKey(0)
    k1, k2 = jax.random.split(key)

    # ---- case 1: small aligned shapes ----
    B, dim_in, dim_out = 16, 32, 32
    x, W, M, b, gw, gb, hbw = make_params(k1, B, dim_in, dim_out)
    t = jnp.float32(0.37)
    ref = reference_forward(t, x, W, M, b, gw, gb, hbw)

    out_f32 = concat_squash_linear_sparse(t, x, W, M, b, gw, gb, hbw)
    out_f32 = jax.block_until_ready(out_f32)
    assert out_f32.shape == (B, dim_out)
    assert jnp.allclose(out_f32, ref, atol=2e-5, rtol=2e-5), \
        f"f32 path max abs err = {jnp.max(jnp.abs(out_f32 - ref))}"

    # ---- cached masked weight reused across multiple "ODE steps" ----
    wm_cached = prepare_masked_weight(W, M, jnp.float32)
    for tv in (0.0, 0.37, 0.9):
        tt = jnp.float32(tv)
        o = concat_squash_linear_sparse(tt, x, None, None, b, gw, gb, hbw,
                                        masked_weight_t=wm_cached)
        o = jax.block_until_ready(o)
        r = reference_forward(tt, x, W, M, b, gw, gb, hbw)
        assert jnp.allclose(o, r, atol=2e-5, rtol=2e-5), \
            f"cached-weight path (t={tv}) max abs err = {jnp.max(jnp.abs(o - r))}"

    # ---- explicit bf16 fast path (f32 accumulation on the MXU) ----
    wm_bf16 = prepare_masked_weight(W, M, jnp.bfloat16)
    out_bf16 = concat_squash_linear_sparse(t, x, None, None, b, gw, gb, hbw,
                                           masked_weight_t=wm_bf16,
                                           compute_dtype=jnp.bfloat16)
    out_bf16 = jax.block_until_ready(out_bf16)
    assert out_bf16.shape == (B, dim_out)
    assert jnp.allclose(out_bf16, ref, atol=5e-2, rtol=5e-2), \
        f"bf16 path max abs err = {jnp.max(jnp.abs(out_bf16 - ref))}"

    # ---- case 2: unaligned shapes (batch padding + full-dim K/N blocks) ----
    B2, di2, do2 = 50, 40, 72
    x2, W2, M2, b2, gw2, gb2, hbw2 = make_params(k2, B2, di2, do2)
    t2 = jnp.float32(1.25)
    ref2 = reference_forward(t2, x2, W2, M2, b2, gw2, gb2, hbw2)
    out2 = concat_squash_linear_sparse(t2, x2, W2, M2, b2, gw2, gb2, hbw2)
    out2 = jax.block_until_ready(out2)
    assert out2.shape == (B2, do2)
    assert jnp.allclose(out2, ref2, atol=2e-5, rtol=2e-5), \
        f"unaligned case max abs err = {jnp.max(jnp.abs(out2 - ref2))}"

    print("KERNEL_OK")
</pallas_src>

<mosaic_0001>
module attributes {stable_mosaic.version = 11 : i64} {
  func.func @_csls_kernel(%arg0: i32, %arg1: memref<16x32xf32, #tpu.memory_space<vmem>>, %arg2: memref<32x32xf32, #tpu.memory_space<vmem>>, %arg3: memref<1x32xf32, #tpu.memory_space<vmem>>, %arg4: memref<1x32xf32, #tpu.memory_space<vmem>>, %arg5: memref<16x32xf32, #tpu.memory_space<vmem>>) attributes {dimension_semantics = [#tpu.dimension_semantics<parallel>], iteration_bounds = array<i64: 1>, scalar_prefetch = 0 : i64, scratch_operands = 0 : i64, tpu.core_type = #tpu.core_type<tc>, window_params = [{transform_indices = @transform_0, window_bounds = array<i64: 16, 32>}, {pipeline_mode = #tpu.pipeline_mode<synchronous>, transform_indices = @transform_1, window_bounds = array<i64: 32, 32>}, {pipeline_mode = #tpu.pipeline_mode<synchronous>, transform_indices = @transform_2, window_bounds = array<i64: 1, 32>}, {pipeline_mode = #tpu.pipeline_mode<synchronous>, transform_indices = @transform_3, window_bounds = array<i64: 1, 32>}, {transform_indices = @transform_4, window_bounds = array<i64: 16, 32>}]} {
    %c0 = arith.constant 0 : index
    %c0_0 = arith.constant 0 : index
    %0 = vector.load %arg1[%c0, %c0_0] : memref<16x32xf32, #tpu.memory_space<vmem>>, vector<16x32xf32>
    %c0_1 = arith.constant 0 : index
    %c0_2 = arith.constant 0 : index
    %1 = vector.load %arg2[%c0_1, %c0_2] : memref<32x32xf32, #tpu.memory_space<vmem>>, vector<32x32xf32>
    %cst = arith.constant dense<0.000000e+00> : vector<16x32xf32>
    %2 = tpu.matmul %0, %1, %cst {dimension_numbers = #tpu.dot_dimension_numbers<[1], [0], [0], [1], [0, 0, 1, 1], [], []>} : vector<16x32xf32>, vector<32x32xf32>, vector<16x32xf32> -> vector<16x32xf32>
    %c0_3 = arith.constant 0 : index
    %c0_4 = arith.constant 0 : index
    %3 = vector.load %arg3[%c0_3, %c0_4] : memref<1x32xf32, #tpu.memory_space<vmem>>, vector<1x32xf32>
    %4 = vector.broadcast %3 : vector<1x32xf32> to vector<16x32xf32>
    %5 = arith.mulf %2, %4 : vector<16x32xf32>
    %c0_5 = arith.constant 0 : index
    %c0_6 = arith.constant 0 : index
    %6 = vector.load %arg4[%c0_5, %c0_6] : memref<1x32xf32, #tpu.memory_space<vmem>>, vector<1x32xf32>
    %7 = vector.broadcast %6 : vector<1x32xf32> to vector<16x32xf32>
    %8 = arith.addf %5, %7 : vector<16x32xf32>
    %c0_7 = arith.constant 0 : index
    %c0_8 = arith.constant 0 : index
    %9 = vector.load %arg5[%c0_7, %c0_8] : memref<16x32xf32, #tpu.memory_space<vmem>>, vector<16x32xf32>
    tpu.vector_store %arg5[%c0_7, %c0_8], %8 {strides = array<i32>} : memref<16x32xf32, #tpu.memory_space<vmem>>, vector<16x32xf32>,
    return
  }
  func.func @transform_0(%arg0: i32) -> (i32, i32) {
    %c0_i32 = arith.constant 0 : i32
    %c0_i32_0 = arith.constant 0 : i32
    return %arg0, %c0_i32 : i32, i32
  }
  func.func @transform_1(%arg0: i32) -> (i32, i32) {
    %c0_i32 = arith.constant 0 : i32
    %c0_i32_0 = arith.constant 0 : i32
    %c0_i32_1 = arith.constant 0 : i32
    return %c0_i32, %c0_i32_0 : i32, i32
  }
  func.func @transform_2(%arg0: i32) -> (i32, i32) {
    %c0_i32 = arith.constant 0 : i32
    %c0_i32_0 = arith.constant 0 : i32
    %c0_i32_1 = arith.constant 0 : i32
    return %c0_i32, %c0_i32_0 : i32, i32
  }
  func.func @transform_3(%arg0: i32) -> (i32, i32) {
    %c0_i32 = arith.constant 0 : i32
    %c0_i32_0 = arith.constant 0 : i32
    %c0_i32_1 = arith.constant 0 : i32
    return %c0_i32, %c0_i32_0 : i32, i32
  }
  func.func @transform_4(%arg0: i32) -> (i32, i32) {
    %c0_i32 = arith.constant 0 : i32
    %c0_i32_0 = arith.constant 0 : i32
    return %arg0, %c0_i32 : i32, i32
  }
}

</mosaic_0001>

<bundles_post_ra>
// kernel: tpu_custom_call.1
= control target key start
LH: loop header
LB: loop body
LE: loop exit
PB: predicated region body
PF: predicated region fallthrough
CT: control target
= control target key end

     0   :  { %9 = vsyncpa [#allocation3], 0  ;;  %s363_s0 = inlined_call_operand.hbm [shape: f32[16,32], index: 0, kind: input, shape index: {}]   ;;  %s364_s1 = inlined_call_operand.hbm [shape: f32[32,32], index: 1, kind: input, shape index: {}]   ;;  %s365_s2 = inlined_call_operand.vmem [shape: f32[1,32], index: 2, kind: input, shape index: {}]   ;;  %s366_s3 = inlined_call_operand.vmem [shape: f32[1,32], index: 3, kind: input, shape index: {}]   ;;  %s367_s4 = inlined_call_operand.hbm [shape: f32[16,32], index: 4, kind: output, shape index: {}]  }
   0x1   :  { %10 = vsyncpa [#allocation6], 0 }
   0x2   :  { %11 = vsyncpa [#allocation4], 0  ;;  %s278_s15 = smov [#allocation2]   ;;  %s206_s19 = scalar_lea.hbm %s363_s0, 256 }
   0x3   :  { %s17_s16 = sshll.u32 %s278_s15, 4  ;;  %p207_p0 = scmp.ne.s32.totalorder %s363_s0, %s206_s19  ;;  %s18_s16 = int_to_ptr.vmem [resolvable:$true] %s17_s16 }
   0x4   :  { %p210_p1 = scmp.lt.u32.totalorder %s206_s19, %s363_s0 }
   0x6   :  { %p212_p2 = pnand %p210_p1, %p207_p0 }
   0x8   :  { %215 = shalt.err (!%p212_p2)
}
   0x9   :  { %s216_s24 = scalar_lea.vmem %s18_s16, 256  ;;  %p221_p4 = scmp.lt.s32.totalorder %s18_s16, %s18_s16 }
   0xa   :  { %p217_p3 = scmp.ne.s32.totalorder %s18_s16, %s216_s24  ;;  %p222_p5 = scmp.lt.s32.totalorder %s216_s24, %s216_s24 }
   0xc   :  { %p223_p6 = por %p222_p5, %p221_p4 }
   0xe   :  { %p224_p7 = pnand %p223_p6, %p217_p3 }
  0x10   :  { %227 = shalt.err (!%p224_p7)
}
  0x11   :  { %s279_s25 = smov 128   ;;  %s280_s26 = smov 8  }
  0x12   :  { %23 = dma.hbm_to_vmem [thread:$0]  %s363_s0, 256, %s18_s16, [#allocation3], %s279_s25, %s279_s25, %s280_s26  }
  0x13   :  { %s281_s29 = smov [#allocation5]   ;;  %s228_s7 = scalar_lea.hbm %s364_s1, 512 }
  0x14   :  { %s29_s30 = sshll.u32 %s281_s29, 4  ;;  %p229_p8 = scmp.ne.s32.totalorder %s364_s1, %s228_s7  ;;  %s30_s30 = int_to_ptr.vmem [resolvable:$true] %s29_s30 }
  0x15   :  { %p232_p9 = scmp.lt.u32.totalorder %s228_s7, %s364_s1 }
  0x17   :  { %p234_p10 = pnand %p232_p9, %p229_p8 }
  0x19   :  { %237 = shalt.err (!%p234_p10)
}
  0x1a   :  { %s238_s12 = scalar_lea.vmem %s30_s30, 512  ;;  %p243_p12 = scmp.lt.s32.totalorder %s30_s30, %s30_s30 }
  0x1b   :  { %p239_p11 = scmp.ne.s32.totalorder %s30_s30, %s238_s12  ;;  %p244_p13 = scmp.lt.s32.totalorder %s238_s12, %s238_s12 }
  0x1d   :  { %p245_p0 = por %p244_p13, %p243_p12 }
  0x1f   :  { %p246_p1 = pnand %p245_p0, %p239_p11 }
  0x21   :  { %249 = shalt.err (!%p246_p1)
}
  0x22   :  { %35 = dma.hbm_to_vmem [thread:$0]  %s364_s1, 512, %s30_s30, [#allocation6], %s279_s25, %s279_s25, %s280_s26  }
  0x23   :  { %272 = dma.done.wait [#allocation3], 256  }
  0x24   :  { %273 = vsyncadd [#allocation3], 4294967040 }
  0x25   :  { %274 = dma.done.wait [#allocation6], 512  }
  0x26   :  { %275 = vsyncadd [#allocation6], 4294966784  ;;  %vm52_vm0 = vcmask 261120   ;;  %v48_v0 = vld [vmem:[#allocation5] sm:$0xff]  ;;  %v49_v1 = vld [vmem:[#allocation5 + $0x8] sm:$0xff]  ;;  %s282_s17 = smov [#allocation7]  }
  0x27   :  { %v50_v2 = vld [vmem:[#allocation5 + $0x10] sm:$0xff]  ;;  %v193_v3 = vpack.c.bf16 %v49_v1, %v48_v0  ;;  %v51_v4 = vld [vmem:[#allocation5 + $0x18] sm:$0xff]  ;;  %s159_s18 = sshll.u32 %s282_s17, 4  ;;  %s160_s18 = int_to_ptr.vmem [resolvable:$true] %s159_s18 }
  0x28   :  { %v46_v5 = vld [vmem:[#allocation2] sm:$0xff]  ;;  %v197_v6 = vpack.c.bf16 %v51_v4, %v50_v2  ;;  %v47_v7 = vld [vmem:[#allocation2 + $0x8] sm:$0xff]  ;;  %s250_s19 = scalar_lea.vmem %s160_s18, 256  ;;  %p255_p3 = scmp.lt.s32.totalorder %s160_s18, %s160_s18 }
  0x29   :  { %190 = vmatprep.mubr.msk.f32.mxu0 %vm52_vm0, %v46_v5  ;;  %194 = vmatprep.subr.bf16.mxu0 %v193_v3  ;;  %v174_v8 = vld [vmem:[%s365_s2] ss:$0 sm:$0xff]  ;;  %p251_p2 = scmp.ne.s32.totalorder %s160_s18, %s250_s19  ;;  %p256_p4 = scmp.lt.s32.totalorder %s250_s19, %s250_s19 }
  0x2a   :  { %196 = vmatpush3.bf16.msra.mxu0 %v193_v3  ;;  %v175_v10 = vld [vmem:[%s366_s3] ss:$0 sm:$0xff] }
  0x2b   :  { %198 = vmatprep.subr.bf16.mxu0 %v197_v6  ;;  %p257_p5 = por %p256_p4, %p255_p3 }
  0x2d   :  { %p258_p6 = pnand %p257_p5, %p251_p2 }
  0x2e   :  { %200 = vmatpush3.bf16.msra.mxu0 %v197_v6 }
  0x31   :  { %191 = vmatmul.mubr.msk.f32.vlgmr.msra.gmra.mrb[0].mxu0 %vm52_vm0, %v47_v7 }
 0x104   :  { %v192_v9 = vpop.f32.mrb[0].mxu0 }
 0x105   :  { %v142_v11 = vmul.f32 %v192_v9, %v174_v8  ;;  %v125_v12 = vpop.f32.mrb[1].mxu0 }
 0x106   :  { %v141_v13 = vmul.f32 %v174_v8, %v125_v12 }
 0x107   :  { %v151_v14 = vadd.f32 %v175_v10, %v142_v11 }
 0x108   :  { %v150_v15 = vadd.f32 %v175_v10, %v141_v13 }
 0x109   :  { %153 = vst.msk [vmem:[#allocation7 + $0x8] sm:$0xff] %vm52_vm0, %v151_v14 }
 0x10a   :  { %152 = vst.msk [vmem:[#allocation7] sm:$0xff] %vm52_vm0, %v150_v15 }
 0x10b   :  { %261 = shalt.err (!%p258_p6)
}
 0x10c   :  { %s262_s20 = scalar_lea.hbm %s367_s4, 256 }
 0x10d   :  { %p263_p7 = scmp.ne.s32.totalorder %s367_s4, %s262_s20  ;;  %p266_p8 = scmp.lt.u32.totalorder %s262_s20, %s367_s4 }
 0x10f   :  { %p268_p9 = pnand %p266_p8, %p263_p7 }
 0x111   :  { %271 = shalt.err (!%p268_p9)
}
 0x112   :  { %165 = dma.vmem_to_hbm [thread:$0]  %s160_s18, 256, %s367_s4, [#allocation4], %s279_s25, %s279_s25, %s280_s26  }
 0x113   :  { %276 = dma.done.wait [#allocation4], 256  }
 0x114   :  { %277 = vsyncadd [#allocation4], 4294967040 }
 0x115   :  { %169 = vsyncpa [#allocation3], 1 }
 0x116   :  { %170 = vsyncpa [#allocation6], 1 }
 0x117   :  { %171 = vsyncpa [#allocation4], 1 }

</bundles_post_ra>
